<compile_context>
chip_gen: v6e
topology: v6e:2x2x1
jax: 0.10.0
libtpu: 0.0.40
codegen_flags: <defaults>
</compile_context>

<pallas_src>
import functools

import jax
import jax.numpy as jnp
from jax.experimental import pallas as pl
from jax.experimental.pallas import tpu as pltpu


def _feature_emb_drug_attention_kernel(x_ref, qv_ref, z_ref, attn_ref, *, x_dim, scale):
    # x_ref:    (Bb, T, D) block of the input
    # qv_ref:   (1, D)     query vector (same block for every grid step)
    # z_ref:    (Bb, D)    output block
    # attn_ref: (Bb, x_dim) output block
    xf = x_ref[...].astype(jnp.float32)                # (Bb, T, D)
    qvf = qv_ref[0].astype(jnp.float32)                # (D,)

    # attention logits: <X[b, t, :], queryv> / sqrt(D)  (single scale, applied once)
    logits = jnp.sum(xf * qvf, axis=-1) * jnp.float32(scale)   # (Bb, T) lane reduce (XLU)

    # numerically stable softmax over the similarity-type axis (torch: Softmax(dim=1))
    m = jnp.max(logits, axis=-1, keepdims=True)
    e = jnp.exp(logits - m)
    s = jnp.sum(e, axis=-1, keepdims=True)
    inv_s = pl.reciprocal(s, approx=True)              # EUP slot
    inv_s = inv_s * (2.0 - s * inv_s)                  # one Newton step -> full f32 accuracy
    attn = e * inv_s                                   # (Bb, T)

    # keep only the first x_dim weights (softmax was over the full T, as in torch);
    # x_dim is a static Python int, so these are zero-cost static slices.
    attn_x = attn[:, :x_dim]                           # (Bb, x_dim)

    # z[b, :] = sum_{t < x_dim} attn[b, t] * X[b, t, :]   (VPU mul + sublane reduce)
    z = jnp.sum(attn_x[:, :, None] * xf[:, :x_dim, :], axis=1)   # (Bb, D)

    z_ref[...] = z.astype(z_ref.dtype)
    attn_ref[...] = attn_x.astype(attn_ref.dtype)


def feature_emb_drug_attention(x, queryv, x_dim, *, block_b=None):
    """x: (B, T, D); queryv: (D,); 0 < x_dim <= T.

    Returns (z, attn) with shapes (B, D), (B, x_dim) matching FeatureEmbDrugAttention."""
    B, T, D = x.shape
    assert queryv.shape == (D,)
    assert 0 < x_dim <= T

    if block_b is None:
        # Size the batch block from a ~4 MiB per-buffer VMEM budget (x2 for the
        # double-buffered input), capped at 512 rows, multiple of 8 when tiled.
        row_bytes = T * D * jnp.dtype(x.dtype).itemsize
        fit = max(8, min(512, (4 << 20) // max(row_bytes, 1)))
        fit = (fit // 8) * 8
        block_b = B if B <= fit else fit

    n_blocks = -(-B // block_b)
    B_pad = n_blocks * block_b
    x_p = x if B_pad == B else jnp.pad(x, ((0, B_pad - B), (0, 0), (0, 0)))
    qv2 = queryv.reshape(1, D)

    kernel = functools.partial(
        _feature_emb_drug_attention_kernel,
        x_dim=int(x_dim),
        scale=float(D) ** -0.5,
    )

    grid_spec = pltpu.PrefetchScalarGridSpec(
        num_scalar_prefetch=0,
        grid=(n_blocks,),
        in_specs=[
            pl.BlockSpec((block_b, T, D), lambda b: (b, 0, 0)),
            pl.BlockSpec((1, D), lambda b: (0, 0)),
        ],
        out_specs=[
            pl.BlockSpec((block_b, D), lambda b: (b, 0)),
            pl.BlockSpec((block_b, x_dim), lambda b: (b, 0)),
        ],
    )

    z_p, attn_p = pl.pallas_call(
        kernel,
        out_shape=(
            jax.ShapeDtypeStruct((B_pad, D), x.dtype),
            jax.ShapeDtypeStruct((B_pad, x_dim), x.dtype),
        ),
        grid_spec=grid_spec,
        compiler_params=pltpu.CompilerParams(
            dimension_semantics=("parallel",),
        ),
    )(x_p, qv2)

    return z_p[:B], attn_p[:B]


def _reference(x, queryv, x_dim):
    # Pure-JAX mirror of the PyTorch forward.
    d = x.shape[-1]
    x_scaled = x / d ** 0.25
    q_scaled = queryv / d ** 0.25
    logits = jnp.einsum("btd,d->bt", x_scaled, q_scaled)
    attn = jax.nn.softmax(logits, axis=1)[:, :x_dim]
    z = jnp.einsum("bt,btd->bd", attn, x[:, :x_dim, :])
    return z, attn


if __name__ == "__main__":
    # Small deterministic inputs: batch=2, similarity-type vector length=8,
    # input_dim (feat_dim)=32, X_dim=6 (exercises the [:, :X_dim] slice).
    B, T, D = 2, 8, 32
    X_dim = 6
    key = jax.random.PRNGKey(0)
    kx, kq = jax.random.split(key)
    x = jax.random.normal(kx, (B, T, D), dtype=jnp.float32)
    queryv = jax.random.normal(kq, (D,), dtype=jnp.float32)

    z, attn = feature_emb_drug_attention(x, queryv, X_dim)
    jax.block_until_ready((z, attn))

    z_ref, attn_ref = _reference(x, queryv, X_dim)

    assert z.shape == (B, D) and attn.shape == (B, X_dim)
    # Tolerances account for the EUP approx-reciprocal (+Newton) softmax denominator.
    assert jnp.allclose(attn, attn_ref, atol=1e-4, rtol=1e-3)
    assert jnp.allclose(z, z_ref, atol=1e-4, rtol=1e-3)
    # Sliced softmax weights are non-negative and sum to at most 1.
    assert bool(jnp.all(attn >= 0.0))
    assert bool(jnp.all(jnp.sum(attn, axis=1) <= 1.0 + 1e-4))

    print("KERNEL_OK")
</pallas_src>

<mosaic_0001>
module attributes {stable_mosaic.version = 11 : i64} {
  func.func @_feature_emb_drug_attention_kernel(%arg0: i32, %arg1: memref<2x8x32xf32, #tpu.memory_space<vmem>>, %arg2: memref<1x32xf32, #tpu.memory_space<vmem>>, %arg3: memref<2x32xf32, #tpu.memory_space<vmem>>, %arg4: memref<2x6xf32, #tpu.memory_space<vmem>>) attributes {dimension_semantics = [#tpu.dimension_semantics<parallel>], iteration_bounds = array<i64: 1>, scalar_prefetch = 0 : i64, scratch_operands = 0 : i64, tpu.core_type = #tpu.core_type<tc>, window_params = [{transform_indices = @transform_0, window_bounds = array<i64: 2, 8, 32>}, {pipeline_mode = #tpu.pipeline_mode<synchronous>, transform_indices = @transform_1, window_bounds = array<i64: 1, 32>}, {transform_indices = @transform_2, window_bounds = array<i64: 2, 32>}, {transform_indices = @transform_3, window_bounds = array<i64: 2, 6>}]} {
    %c0 = arith.constant 0 : index
    %c0_0 = arith.constant 0 : index
    %c0_1 = arith.constant 0 : index
    %0 = vector.load %arg1[%c0, %c0_0, %c0_1] : memref<2x8x32xf32, #tpu.memory_space<vmem>>, vector<2x8x32xf32>
    %c0_2 = arith.constant 0 : index
    %c0_3 = arith.constant 0 : index
    %1 = vector.load %arg2[%c0_2, %c0_3] : memref<1x32xf32, #tpu.memory_space<vmem>>, vector<1x32xf32>
    %2 = vector.shape_cast %1 : vector<1x32xf32> to vector<32xf32>
    %3 = vector.shape_cast %2 : vector<32xf32> to vector<1x1x32xf32>
    %4 = vector.broadcast %3 : vector<1x1x32xf32> to vector<2x8x32xf32>
    %5 = arith.mulf %0, %4 : vector<2x8x32xf32>
    %cst = arith.constant dense<0.000000e+00> : vector<2x8xf32>
    %6 = vector.multi_reduction <add>, %5, %cst [2] : vector<2x8x32xf32> to vector<2x8xf32>
    %cst_4 = arith.constant 0.176776692 : f32
    %7 = vector.broadcast %cst_4 : f32 to vector<2x8xf32>
    %8 = arith.mulf %6, %7 : vector<2x8xf32>
    %cst_5 = arith.constant dense<0xFF800000> : vector<2xf32>
    %9 = vector.multi_reduction <maximumf>, %8, %cst_5 [1] : vector<2x8xf32> to vector<2xf32>
    %10 = vector.shape_cast %9 : vector<2xf32> to vector<2x1xf32>
    %11 = vector.broadcast %10 : vector<2x1xf32> to vector<2x8xf32>
    %12 = arith.subf %8, %11 : vector<2x8xf32>
    %13 = math.exp %12 : vector<2x8xf32>
    %cst_6 = arith.constant dense<0.000000e+00> : vector<2xf32>
    %14 = vector.multi_reduction <add>, %13, %cst_6 [1] : vector<2x8xf32> to vector<2xf32>
    %15 = vector.shape_cast %14 : vector<2xf32> to vector<2x1xf32>
    %16 = tpu.reciprocal %15 {approx = true} : vector<2x1xf32> -> vector<2x1xf32>
    %17 = arith.mulf %15, %16 : vector<2x1xf32>
    %cst_7 = arith.constant 2.000000e+00 : f32
    %18 = vector.broadcast %cst_7 : f32 to vector<2x1xf32>
    %19 = arith.subf %18, %17 : vector<2x1xf32>
    %20 = arith.mulf %16, %19 : vector<2x1xf32>
    %21 = vector.broadcast %20 : vector<2x1xf32> to vector<2x8xf32>
    %22 = arith.mulf %13, %21 : vector<2x8xf32>
    %23 = vector.extract_strided_slice %22 {offsets = [0, 0], sizes = [2, 6], strides = [1, 1]} : vector<2x8xf32> to vector<2x6xf32>
    %24 = vector.shape_cast %23 : vector<2x6xf32> to vector<2x6x1xf32>
    %25 = vector.extract_strided_slice %0 {offsets = [0, 0, 0], sizes = [2, 6, 32], strides = [1, 1, 1]} : vector<2x8x32xf32> to vector<2x6x32xf32>
    %26 = vector.broadcast %24 : vector<2x6x1xf32> to vector<2x6x32xf32>
    %27 = arith.mulf %26, %25 : vector<2x6x32xf32>
    %cst_8 = arith.constant dense<0.000000e+00> : vector<2x32xf32>
    %28 = vector.multi_reduction <add>, %27, %cst_8 [1] : vector<2x6x32xf32> to vector<2x32xf32>
    %c0_9 = arith.constant 0 : index
    %c0_10 = arith.constant 0 : index
    %29 = vector.load %arg3[%c0_9, %c0_10] : memref<2x32xf32, #tpu.memory_space<vmem>>, vector<2x32xf32>
    tpu.vector_store %arg3[%c0_9, %c0_10], %28 {strides = array<i32>} : memref<2x32xf32, #tpu.memory_space<vmem>>, vector<2x32xf32>,
    %c0_11 = arith.constant 0 : index
    %c0_12 = arith.constant 0 : index
    %30 = vector.load %arg4[%c0_11, %c0_12] : memref<2x6xf32, #tpu.memory_space<vmem>>, vector<2x6xf32>
    tpu.vector_store %arg4[%c0_11, %c0_12], %23 {strides = array<i32>} : memref<2x6xf32, #tpu.memory_space<vmem>>, vector<2x6xf32>,
    return
  }
  func.func @transform_0(%arg0: i32) -> (i32, i32, i32) {
    %c0_i32 = arith.constant 0 : i32
    %c0_i32_0 = arith.constant 0 : i32
    %c0_i32_1 = arith.constant 0 : i32
    return %arg0, %c0_i32, %c0_i32_0 : i32, i32, i32
  }
  func.func @transform_1(%arg0: i32) -> (i32, i32) {
    %c0_i32 = arith.constant 0 : i32
    %c0_i32_0 = arith.constant 0 : i32
    %c0_i32_1 = arith.constant 0 : i32
    return %c0_i32, %c0_i32_0 : i32, i32
  }
  func.func @transform_2(%arg0: i32) -> (i32, i32) {
    %c0_i32 = arith.constant 0 : i32
    %c0_i32_0 = arith.constant 0 : i32
    return %arg0, %c0_i32 : i32, i32
  }
  func.func @transform_3(%arg0: i32) -> (i32, i32) {
    %c0_i32 = arith.constant 0 : i32
    %c0_i32_0 = arith.constant 0 : i32
    return %arg0, %c0_i32 : i32, i32
  }
}

</mosaic_0001>

<bundles_post_ra>
// kernel: tpu_custom_call.1
= control target key start
LH: loop header
LB: loop body
LE: loop exit
PB: predicated region body
PF: predicated region fallthrough
CT: control target
= control target key end

     0   :  { %9 = vsyncpa [#allocation3], 0  ;;  %s338_s0 = inlined_call_operand.hbm [shape: f32[2,8,32], index: 0, kind: input, shape index: {}]   ;;  %s339_s1 = inlined_call_operand.vmem [shape: f32[1,32], index: 1, kind: input, shape index: {}]   ;;  %s340_s2 = inlined_call_operand.hbm [shape: f32[2,32], index: 2, kind: output, shape index: {0}]   ;;  %s341_s3 = inlined_call_operand.hbm [shape: f32[2,6], index: 3, kind: output, shape index: {1}]  }
   0x1   :  { %10 = vsyncpa [#allocation4], 0 }
   0x2   :  { %11 = vsyncpa [#allocation7], 0  ;;  %s278_s12 = smov [#allocation2]  }
   0x3   :  { %s17_s13 = sshll.u32 %s278_s12, 4  ;;  %s18_s13 = int_to_ptr.vmem [resolvable:$true] %s17_s13 }
   0x4   :  { %s220_s14 = scalar_lea.vmem %s18_s13, 256  ;;  %p225_p1 = scmp.lt.s32.totalorder %s18_s13, %s18_s13 }
   0x5   :  { %p221_p0 = scmp.ne.s32.totalorder %s18_s13, %s220_s14  ;;  %p226_p2 = scmp.lt.s32.totalorder %s220_s14, %s220_s14 }
   0x7   :  { %p227_p3 = por %p226_p2, %p225_p1 }
   0x9   :  { %p228_p4 = pnand %p227_p3, %p221_p0 }
   0xb   :  { %231 = shalt.err (!%p228_p4)
}
   0xc   :  { %s279_s15 = smov 128   ;;  %s280_s16 = smov 8  }
   0xd   :  { %23 = dma.hbm_to_vmem [thread:$0]  %s338_s0, 256, %s18_s13, [#allocation3], %s279_s15, %s279_s15, %s280_s16  }
   0xe   :  { %272 = dma.done.wait [#allocation3], 256  }
   0xf   :  { %273 = vsyncadd [#allocation3], 4294967040  ;;  %v307_v0 = vld [vmem:[#allocation2] sm:$0xff]  ;;  %vm40_vm0 = vcmask 261120   ;;  %v312_v2 = vld [vmem:[#allocation2 + $0x8] sm:$0xff]  ;;  %v51_v7 = vlaneseq  ;;  %vm61_vm1 = vcmask 1041409  }
  0x10   :  { %v197_v1 = vld [vmem:[%s339_s1] ss:$0 sm:$0xff]  ;;  %vm64_vm2 = vcmask 58368   ;;  %v281_v19 = vmov 0   ;;  %vm135_vm3 = vcmask 259072   ;;  %s282_s0 = smov [#allocation6]  }
  0x11   :  { %v38_v3 = vmul.f32 %v197_v1, %v307_v0  ;;  %v39_v4 = vmul.f32 %v197_v1, %v312_v2  ;;  %v52_v8 = vand.u32 127, %v51_v7  ;;  %v54_v9 = vshrl.u32 %v51_v7, 7  ;;  %205 = vset.pattern.permute.xlu0 %v281_v19  ;;  %204 = vset.pattern.permute.xlu1 %v281_v19  ;;  %s184_s1 = sshll.u32 %s282_s0, 4  ;;  %s185_s1 = int_to_ptr.vmem [resolvable:$true] %s184_s1 }
  0x12   :  { %vm166_vm4 = vcmask 41984   ;;  %s232_s21 = scalar_lea.vmem %s185_s1, 32  ;;  %p237_p6 = scmp.lt.s32.totalorder %s185_s1, %s185_s1 }
  0x13   :  { %v41_v5 = vsel %vm40_vm0, %v38_v3, 0.0  ;;  %v44_v6 = vsel %vm40_vm0, %v39_v4, 0.0  ;;  %v316_v11 = vsub.s32 %v52_v8, %v54_v9  ;;  %v71_v20 = vsub.s32 0, %v54_v9  ;;  %p233_p5 = scmp.ne.s32.totalorder %s185_s1, %s232_s21  ;;  %p238_p7 = scmp.lt.s32.totalorder %s232_s21, %s232_s21 }
  0x14   :  { %42 = vadd.xlane.f32.xlu0 %v41_v5  ;;  %v75_v21 = vsub.s32 1, %v54_v9 }
  0x15   :  { %p239_p8 = por %p238_p7, %p237_p6 }
  0x17   :  { %p240_p9 = pnand %p239_p8, %p233_p5 }
  0x18   :  { %45 = vadd.xlane.f32.xlu0 %v44_v6 }
  0x9d   :  { %v43_v10 = vpop.xlane.xlu0 %42 }
  0x9e   :  { %v47_v12 = vmul.f32 0.17677669, %v43_v10 }
  0xa0   :  { %v56_v15 = vrot.slane %v47_v12, %v316_v11 }
  0xa1   :  { %v46_v13 = vpop.xlane.xlu0 %45 }
  0xa2   :  { %v48_v14 = vmul.f32 0.17677669, %v46_v13 }
  0xa4   :  { %v60_v16 = vrot.slane %v48_v14, %v316_v11 }
  0xa6   :  { %v62_v17 = vsel %vm61_vm1, %v60_v16, %v56_v15 }
  0xa7   :  { %v65_v18 = vsel %vm64_vm2, %v62_v17, -inf }
  0xa8   :  { %66 = vmax.xlane.f32.xlu1 %v65_v18 }
 0x131   :  { %v67_v22 = vpop.xlane.xlu1 %66 }
 0x132   :  { %v72_v23 = vrot.slane %v67_v22, %v71_v20  ;;  %v76_v24 = vrot.slane %v67_v22, %v75_v21 }
 0x134   :  { %v79_v25 = vsub.f32 %v47_v12, %v72_v23  ;;  %v80_v26 = vsub.f32 %v48_v14, %v76_v24 }
 0x136   :  { %v81_v27 = vmul.f32 1.442695, %v79_v25  ;;  %v83_v28 = vmul.f32 1.442695, %v80_v26 }
 0x138   :  { %206 = vpow2.f32 %v81_v27 }
 0x139   :  { %208 = vpow2.f32 %v83_v28 }
 0x145   :  { %v207_v29 = vpop.eup %206 }
 0x146   :  { %v209_v30 = vpop.eup %208  ;;  %88 = vperm.xlu1 %204, %v207_v29  }
 0x147   :  { %91 = vperm.xlu0 %205, %v209_v30  }
 0x1c1   :  { %v89_v31 = vpop.permute.xlu1 %88 }
 0x1c2   :  { %v92_v32 = vpop.permute.xlu0 %91  ;;  %v96_v33 = vrot.slane %v89_v31, %v316_v11 }
 0x1c3   :  { %v100_v34 = vrot.slane %v92_v32, %v316_v11 }
 0x1c5   :  { %v101_v35 = vsel %vm61_vm1, %v100_v34, %v96_v33 }
 0x1c6   :  { %v103_v36 = vsel %vm64_vm2, %v101_v35, 0.0 }
 0x1c7   :  { %104 = vadd.xlane.f32.xlu1 %v103_v36 }
 0x250   :  { %v105_v37 = vpop.xlane.xlu1 %104 }
 0x251   :  { %210 = vrcp.f32 %v105_v37 }
 0x25e   :  { %v211_v38 = vpop.eup %210 }
 0x25f   :  { %v107_v39 = vmul.f32 %v211_v38, %v105_v37 }
 0x261   :  { %v108_v40 = vsub.f32 2.0, %v107_v39 }
 0x263   :  { %v109_v41 = vmul.f32 %v211_v38, %v108_v40 }
 0x265   :  { %v114_v42 = vrot.slane %v109_v41, %v71_v20  ;;  %v118_v43 = vrot.slane %v109_v41, %v75_v21 }
 0x267   :  { %v121_v44 = vmul.f32 %v207_v29, %v114_v42  ;;  %v122_v45 = vmul.f32 %v209_v30, %v118_v43 }
 0x269   :  { %125 = vperm.xlu0 %205, %v121_v44  }
 0x26d   :  { %130 = vperm.xlu0 %205, %v122_v45  }
 0x2e4   :  { %v126_v46 = vpop.permute.xlu0 %125 }
 0x2e5   :  { %v133_v47 = vmul.f32 %v126_v46, %v307_v0  ;;  %v159_v51 = vrot.slane %v126_v46, %v316_v11 }
 0x2e7   :  { %v136_v48 = vsel %vm135_vm3, %v133_v47, 0.0 }
 0x2e8   :  { %v137_v49 = vrot.slane %v136_v48, 4  ;;  %v131_v50 = vpop.permute.xlu0 %130 }
 0x2e9   :  { %v134_v52 = vmul.f32 %v131_v50, %v312_v2  ;;  %v163_v53 = vrot.slane %v131_v50, %v316_v11 }
 0x2ea   :  { %v138_v54 = vadd.f32 %v137_v49, %v136_v48 }
 0x2eb   :  { %v143_v55 = vsel %vm135_vm3, %v134_v52, 0.0  ;;  %v164_v56 = vsel %vm61_vm1, %v163_v53, %v159_v51 }
 0x2ec   :  { %v139_v57 = vrot.slane %v138_v54, 2  ;;  %v144_v58 = vrot.slane %v143_v55, 4  ;;  %167 = vst.msk [vmem:[#allocation6] sm:$0x3] %vm166_vm4, %v164_v56 }
 0x2ed   :  { %243 = shalt.err (!%p240_p9)
}
 0x2ee   :  { %187 = dma.vmem_to_hbm [thread:$0]  %s185_s1, 32, %s341_s3, [#allocation7]   ;;  %v140_v59 = vadd.f32 %v139_v57, %v138_v54  ;;  %v145_v60 = vadd.f32 %v144_v58, %v143_v55  ;;  %vm154_vm5 = vcmask 254976  }
 0x2ef   :  { %s283_s24 = smov [#allocation5]  }
 0x2f0   :  { %v146_v61 = vrot.slane %v145_v60, 2  ;;  %v141_v62 = vrot.slane %v140_v59, 1  ;;  %s174_s25 = sshll.u32 %s283_s24, 4  ;;  %s175_s25 = int_to_ptr.vmem [resolvable:$true] %s174_s25 }
 0x2f1   :  { %s252_s26 = scalar_lea.vmem %s175_s25, 32  ;;  %p257_p11 = scmp.lt.s32.totalorder %s175_s25, %s175_s25 }
 0x2f2   :  { %v147_v63 = vadd.f32 %v146_v61, %v145_v60  ;;  %v142_v2 = vadd.f32 %v141_v62, %v140_v59  ;;  %p253_p10 = scmp.ne.s32.totalorder %s175_s25, %s252_s26  ;;  %p258_p12 = scmp.lt.s32.totalorder %s252_s26, %s252_s26 }
 0x2f4   :  { %v148_v0 = vrot.slane %v147_v63, 1  ;;  %p259_p13 = por %p258_p12, %p257_p11 }
 0x2f6   :  { %v149_v1 = vadd.f32 %v148_v0, %v147_v63  ;;  %p260_p0 = pnand %p259_p13, %p253_p10 }
 0x2f8   :  { %v152_v3 = vsel %vm61_vm1, %v149_v1, %v142_v2 }
 0x2f9   :  { %155 = vst.msk [vmem:[#allocation5] sm:$0x3] %vm154_vm5, %v152_v3 }
 0x2fa   :  { %263 = shalt.err (!%p260_p0)
}
 0x2fb   :  { %177 = dma.vmem_to_hbm [thread:$0]  %s175_s25, 32, %s340_s2, [#allocation4]  }
 0x2fc   :  { %274 = dma.done.wait [#allocation4], 32  }
 0x2fd   :  { %275 = vsyncadd [#allocation4], 4294967264 }
 0x2fe   :  { %276 = dma.done.wait [#allocation7], 32  }
 0x2ff   :  { %277 = vsyncadd [#allocation7], 4294967264 }
 0x300   :  { %194 = vsyncpa [#allocation3], 1 }
 0x301   :  { %195 = vsyncpa [#allocation4], 1 }
 0x302   :  { %196 = vsyncpa [#allocation7], 1 }

</bundles_post_ra>
